<compile_context>
chip_gen: v7x
topology: tpu7x:2x2x1
jax: 0.10.0
libtpu: 0.0.40
codegen_flags: <defaults>
</compile_context>

<pallas_src>
import jax
import jax.numpy as jnp
from jax.experimental import pallas as pl
from jax.experimental.pallas import tpu as pltpu


def _round_up(n, m):
    return ((n + m - 1) // m) * m


def domain_adapter_kernel(x_ref, w1_ref, b1_ref, w2_ref, b2_ref, o_ref):
    """Fused fc1 -> ReLU -> fc2. Matmuls on the MXU with f32 accumulation;
    bias-add and ReLU stay in f32 on the VPU."""
    x = x_ref[...]
    h = jnp.dot(x, w1_ref[...], preferred_element_type=jnp.float32)
    h = jnp.maximum(h + b1_ref[...], 0.0)
    out = jnp.dot(h.astype(w2_ref.dtype), w2_ref[...],
                  preferred_element_type=jnp.float32)
    o_ref[...] = (out + b2_ref[...]).astype(o_ref.dtype)


def domain_adapter_forward(x, w1_t, b1, w2_t, b2, *, tile_b=1024,
                           compute_dtype=jnp.bfloat16, out_dtype=None):
    """DomainAdapter forward: relu(x @ W1^T + b1) @ W2^T + b2.

    x:    (B, D_in)
    w1_t: (D_in, H)   fc1 weight, pre-transposed to (in, out)
    b1:   (1, H)
    w2_t: (H, D_in)   fc2 weight, pre-transposed to (in, out)
    b2:   (1, D_in)
    compute_dtype: dtype for x / W1 / W2 on the MXU (default bf16; the shape is
                   HBM-bound on every TPU generation so halving bytes is the
                   dominant lever). Accumulation, biases and ReLU stay in f32.
                   Pass None for a bit-exact f32 path.
    out_dtype:     output dtype; defaults to compute_dtype (or x.dtype if
                   compute_dtype is None) to also halve the store stream.
    """
    in_dtype = x.dtype
    if out_dtype is None:
        out_dtype = compute_dtype if compute_dtype is not None else in_dtype
    if compute_dtype is not None:
        x = x.astype(compute_dtype)
        w1_t = w1_t.astype(compute_dtype)
        w2_t = w2_t.astype(compute_dtype)
    # Keep bias-add / ReLU in f32 (cheap on VPU, avoids extra cast traffic on v5e).
    b1 = b1.astype(jnp.float32)
    b2 = b2.astype(jnp.float32)

    B, D = x.shape
    H = w1_t.shape[1]

    # Batch tile: large (default 1024), clamped to B, aligned to sublane packing.
    row_align = 16 if x.dtype == jnp.bfloat16 else 8
    tile_b = min(int(tile_b), _round_up(B, row_align))
    if B > row_align:
        # Enforce >= 2 grid steps so v7x can shard the "parallel" axis over both TCs.
        tile_b = min(tile_b, _round_up(pl.cdiv(B, 2), row_align))
    tile_b = max(row_align, _round_up(tile_b, row_align))

    # Pad the batch to a multiple of tile_b: no OOB reads on the last tile, no
    # masked partial stores. Sliced off below.
    B_pad = _round_up(B, tile_b)
    if B_pad != B:
        x = jnp.pad(x, ((0, B_pad - B), (0, 0)))
    grid = (B_pad // tile_b,)

    # Streamed x gets 3 buffers when the grid is long enough (DMA-bound pipeline);
    # weights / biases are loop-invariant -> a single VMEM buffer is enough.
    x_buffers = 3 if grid[0] >= 3 else 2
    resident = dict(pipeline_mode=pl.Buffered(1))

    # VMEM budget: actual need with ~1.5x slack, floored at 16 MiB, capped at
    # 48 MiB (v7x physical VMEM is 64 MiB per TC; leave headroom).
    xb = jnp.dtype(x.dtype).itemsize
    ob = jnp.dtype(out_dtype).itemsize
    wb = jnp.dtype(w1_t.dtype).itemsize
    vmem_need = (x_buffers * tile_b * D * xb          # x tiles
                 + 2 * tile_b * D * ob                # out tiles (double-buffered)
                 + 2 * D * H * wb                     # resident W1, W2
                 + (H + D) * 4                        # resident biases (f32)
                 + tile_b * H * 4)                    # f32 hidden temporary
    vmem_limit = min(max(int(vmem_need * 1.5), 16 * 1024 * 1024), 48 * 1024 * 1024)

    out = pl.pallas_call(
        domain_adapter_kernel,
        out_shape=jax.ShapeDtypeStruct((B_pad, D), out_dtype),
        grid_spec=pltpu.PrefetchScalarGridSpec(
            num_scalar_prefetch=0,
            grid=grid,
            in_specs=[
                pl.BlockSpec((tile_b, D), lambda i: (i, 0),
                             pipeline_mode=pl.Buffered(x_buffers)),  # x (streamed)
                pl.BlockSpec((D, H), lambda i: (0, 0), **resident),  # W1^T (resident)
                pl.BlockSpec((1, H), lambda i: (0, 0), **resident),  # b1
                pl.BlockSpec((H, D), lambda i: (0, 0), **resident),  # W2^T (resident)
                pl.BlockSpec((1, D), lambda i: (0, 0), **resident),  # b2
            ],
            out_specs=pl.BlockSpec((tile_b, D), lambda i: (i, 0)),
        ),
        compiler_params=pltpu.CompilerParams(
            dimension_semantics=("parallel",),
            vmem_limit_bytes=vmem_limit,
        ),
    )(x, w1_t, b1, w2_t, b2)
    return out[:B] if B_pad != B else out


def init_params(key, input_dim=512, hidden_dim=256, dtype=jnp.float32):
    """Deterministic PyTorch-style Linear init: U(-1/sqrt(fan_in), 1/sqrt(fan_in))."""
    k1, k2, k3, k4 = jax.random.split(key, 4)
    bound1 = 1.0 / (input_dim ** 0.5)
    bound2 = 1.0 / (hidden_dim ** 0.5)
    # PyTorch stores weight as (out, in); we keep the transposed (in, out) layout.
    w1_t = jax.random.uniform(k1, (input_dim, hidden_dim), dtype, -bound1, bound1)
    b1 = jax.random.uniform(k2, (1, hidden_dim), dtype, -bound1, bound1)
    w2_t = jax.random.uniform(k3, (hidden_dim, input_dim), dtype, -bound2, bound2)
    b2 = jax.random.uniform(k4, (1, input_dim), dtype, -bound2, bound2)
    return w1_t, b1, w2_t, b2


if __name__ == "__main__":
    input_dim, hidden_dim, batch = 512, 256, 32
    key = jax.random.PRNGKey(0)
    kx, kp = jax.random.split(key)
    x = jax.random.normal(kx, (batch, input_dim), jnp.float32)
    w1_t, b1, w2_t, b2 = init_params(kp, input_dim, hidden_dim)

    # Exact f32 path: check against the pure-JAX reference.
    out_f32 = jax.block_until_ready(
        domain_adapter_forward(x, w1_t, b1, w2_t, b2, compute_dtype=None))
    ref = jnp.maximum(x @ w1_t + b1, 0.0) @ w2_t + b2
    assert out_f32.shape == (batch, input_dim)
    assert out_f32.dtype == jnp.float32
    assert jnp.allclose(out_f32, ref, atol=1e-4, rtol=1e-4)

    # Default (recommended) bf16 compute + bf16 output path: check against a
    # matching mixed-precision reference.
    out_bf16 = jax.block_until_ready(domain_adapter_forward(x, w1_t, b1, w2_t, b2))
    assert out_bf16.shape == (batch, input_dim)
    assert out_bf16.dtype == jnp.bfloat16
    xb16 = x.astype(jnp.bfloat16)
    w1b = w1_t.astype(jnp.bfloat16)
    w2b = w2_t.astype(jnp.bfloat16)
    h_ref = jnp.maximum(jnp.dot(xb16, w1b, preferred_element_type=jnp.float32) + b1, 0.0)
    ref_bf16 = (jnp.dot(h_ref.astype(jnp.bfloat16), w2b,
                        preferred_element_type=jnp.float32) + b2).astype(jnp.bfloat16)
    assert jnp.allclose(out_bf16.astype(jnp.float32), ref_bf16.astype(jnp.float32),
                        atol=5e-2, rtol=5e-2)

    print("KERNEL_OK")
</pallas_src>

<mosaic_0001>
module attributes {stable_mosaic.version = 11 : i64} {
  func.func @domain_adapter_kernel(%arg0: i32, %arg1: memref<16x512xf32, #tpu.memory_space<vmem>>, %arg2: memref<512x256xf32, #tpu.memory_space<vmem>>, %arg3: memref<1x256xf32, #tpu.memory_space<vmem>>, %arg4: memref<256x512xf32, #tpu.memory_space<vmem>>, %arg5: memref<1x512xf32, #tpu.memory_space<vmem>>, %arg6: memref<16x512xf32, #tpu.memory_space<vmem>>) attributes {dimension_semantics = [#tpu.dimension_semantics<parallel>], iteration_bounds = array<i64: 2>, scalar_prefetch = 0 : i64, scratch_operands = 0 : i64, tpu.core_type = #tpu.core_type<tc>, window_params = [{pipeline_mode = #tpu.pipeline_mode<double_buffered>, transform_indices = @transform_0, window_bounds = array<i64: 16, 512>}, {pipeline_mode = #tpu.pipeline_mode<synchronous>, transform_indices = @transform_1, window_bounds = array<i64: 512, 256>}, {pipeline_mode = #tpu.pipeline_mode<synchronous>, transform_indices = @transform_2, window_bounds = array<i64: 1, 256>}, {pipeline_mode = #tpu.pipeline_mode<synchronous>, transform_indices = @transform_3, window_bounds = array<i64: 256, 512>}, {pipeline_mode = #tpu.pipeline_mode<synchronous>, transform_indices = @transform_4, window_bounds = array<i64: 1, 512>}, {transform_indices = @transform_5, window_bounds = array<i64: 16, 512>}]} {
    %c0 = arith.constant 0 : index
    %c0_0 = arith.constant 0 : index
    %0 = vector.load %arg1[%c0, %c0_0] : memref<16x512xf32, #tpu.memory_space<vmem>>, vector<16x512xf32>
    %c0_1 = arith.constant 0 : index
    %c0_2 = arith.constant 0 : index
    %1 = vector.load %arg2[%c0_1, %c0_2] : memref<512x256xf32, #tpu.memory_space<vmem>>, vector<512x256xf32>
    %cst = arith.constant dense<0.000000e+00> : vector<16x256xf32>
    %2 = tpu.matmul %0, %1, %cst {dimension_numbers = #tpu.dot_dimension_numbers<[1], [0], [0], [1], [0, 0, 1, 1], [], []>} : vector<16x512xf32>, vector<512x256xf32>, vector<16x256xf32> -> vector<16x256xf32>
    %c0_3 = arith.constant 0 : index
    %c0_4 = arith.constant 0 : index
    %3 = vector.load %arg3[%c0_3, %c0_4] : memref<1x256xf32, #tpu.memory_space<vmem>>, vector<1x256xf32>
    %4 = vector.broadcast %3 : vector<1x256xf32> to vector<16x256xf32>
    %5 = arith.addf %2, %4 : vector<16x256xf32>
    %cst_5 = arith.constant 0.000000e+00 : f32
    %6 = vector.broadcast %cst_5 : f32 to vector<16x256xf32>
    %7 = arith.maximumf %5, %6 : vector<16x256xf32>
    %c0_6 = arith.constant 0 : index
    %c0_7 = arith.constant 0 : index
    %8 = vector.load %arg4[%c0_6, %c0_7] : memref<256x512xf32, #tpu.memory_space<vmem>>, vector<256x512xf32>
    %cst_8 = arith.constant dense<0.000000e+00> : vector<16x512xf32>
    %9 = tpu.matmul %7, %8, %cst_8 {dimension_numbers = #tpu.dot_dimension_numbers<[1], [0], [0], [1], [0, 0, 1, 1], [], []>} : vector<16x256xf32>, vector<256x512xf32>, vector<16x512xf32> -> vector<16x512xf32>
    %c0_9 = arith.constant 0 : index
    %c0_10 = arith.constant 0 : index
    %10 = vector.load %arg5[%c0_9, %c0_10] : memref<1x512xf32, #tpu.memory_space<vmem>>, vector<1x512xf32>
    %11 = vector.broadcast %10 : vector<1x512xf32> to vector<16x512xf32>
    %12 = arith.addf %9, %11 : vector<16x512xf32>
    %c0_11 = arith.constant 0 : index
    %c0_12 = arith.constant 0 : index
    %13 = vector.load %arg6[%c0_11, %c0_12] : memref<16x512xf32, #tpu.memory_space<vmem>>, vector<16x512xf32>
    tpu.vector_store %arg6[%c0_11, %c0_12], %12 {strides = array<i32>} : memref<16x512xf32, #tpu.memory_space<vmem>>, vector<16x512xf32>,
    return
  }
  func.func @transform_0(%arg0: i32) -> (i32, i32) {
    %c0_i32 = arith.constant 0 : i32
    %c0_i32_0 = arith.constant 0 : i32
    return %arg0, %c0_i32 : i32, i32
  }
  func.func @transform_1(%arg0: i32) -> (i32, i32) {
    %c0_i32 = arith.constant 0 : i32
    %c0_i32_0 = arith.constant 0 : i32
    %c0_i32_1 = arith.constant 0 : i32
    return %c0_i32, %c0_i32_0 : i32, i32
  }
  func.func @transform_2(%arg0: i32) -> (i32, i32) {
    %c0_i32 = arith.constant 0 : i32
    %c0_i32_0 = arith.constant 0 : i32
    %c0_i32_1 = arith.constant 0 : i32
    return %c0_i32, %c0_i32_0 : i32, i32
  }
  func.func @transform_3(%arg0: i32) -> (i32, i32) {
    %c0_i32 = arith.constant 0 : i32
    %c0_i32_0 = arith.constant 0 : i32
    %c0_i32_1 = arith.constant 0 : i32
    return %c0_i32, %c0_i32_0 : i32, i32
  }
  func.func @transform_4(%arg0: i32) -> (i32, i32) {
    %c0_i32 = arith.constant 0 : i32
    %c0_i32_0 = arith.constant 0 : i32
    %c0_i32_1 = arith.constant 0 : i32
    return %c0_i32, %c0_i32_0 : i32, i32
  }
  func.func @transform_5(%arg0: i32) -> (i32, i32) {
    %c0_i32 = arith.constant 0 : i32
    %c0_i32_0 = arith.constant 0 : i32
    return %arg0, %c0_i32 : i32, i32
  }
}

</mosaic_0001>

<bundles_post_ra>
// kernel: tpu_custom_call.1
= control target key start
LH: loop header
LB: loop body
LE: loop exit
PB: predicated region body
PF: predicated region fallthrough
CT: control target
= control target key end

     0   :  { %10 = vsyncpa [#allocation3], 0  ;;  %s1854_s0 = inlined_call_operand.hbm [shape: f32[32,512], index: 0, kind: input, shape index: {}]   ;;  %s1855_s1 = inlined_call_operand.hbm [shape: f32[512,256], index: 1, kind: input, shape index: {}]   ;;  %s1856_s2 = inlined_call_operand.vmem [shape: f32[1,256], index: 2, kind: input, shape index: {}]   ;;  %s1857_s3 = inlined_call_operand.hbm [shape: f32[256,512], index: 3, kind: input, shape index: {}]   ;;  %s1858_s4 = inlined_call_operand.vmem [shape: f32[1,512], index: 4, kind: input, shape index: {}]   ;;  %s1859_s5 = inlined_call_operand.hbm [shape: f32[32,512], index: 5, kind: output, shape index: {}]  }
   0x1   :  { %12 = vsyncpa [#allocation3 + $0x1], 0 }
   0x2   :  { %13 = vsyncpa [#allocation6], 0 }
   0x3   :  { %14 = vsyncpa [#allocation4], 0 }
   0x4   :  { %16 = vsyncpa [#allocation4 + $0x1], 0  ;;  %s1559_s18 = smov 0   ;;  %s1561_s19 = smov 0  }
   0x5   :  { %s1563_s20 = smov 0   ;;  %s1565_s21 = smov 0  }
   0x6 LB: > { %s1580_s22 = sadd.s32 4294967295, %s1517_s21   ;;  %s1000_s23 = sadd.s32 4294967294, %s1517_s21   ;;  %s1517_s21 = sphi %s1565_s21, %s1879_s21   ;;  %s1513_s20 = sphi %s1563_s20, %s1878_s20   ;;  %s1509_s19 = sphi %s1561_s19, %s1877_s19   ;;  %s1505_s18 = sphi %s1559_s18, %s1876_s18  }
   0x7   : > { %p42_p0 = scmp.ne.s32.totalorder %s1509_s19, %s1505_s18  ;;  %p1860_p1 = scmp.eq.s32.totalorder %s1580_s22, 0 }
   0x8   : > { %p156_p3 = scmp.eq.s32.totalorder %s1000_s23, 1  ;;  %p1001_p5 = scmp.ge.s32.totalorder %s1517_s21, 1 }
   0x9   : > { %p1589_p4 = por %p1860_p1, %p42_p0  ;;  %p163_p7 = scmp.lt.s32.totalorder %s1517_s21, 3 }
   0xa   : > { %p1594_p6 = por %p156_p3, %p42_p0  ;;  %s1519_s27 = smov [#allocation5]  }
   0xb   : > { %s1863_s24 = scalar_select %p1589_p4, 1, 0 }
   0xc   : > { %s1864_s25 = scalar_select %p1594_p6, 1, 0 }
   0xd   : > { %p1599_p8 = pnand %p1001_p5, %p163_p7  ;;  %s175_s28 = sshll.u32 %s1519_s27, 4  ;;  %s1603_s28 = int_to_ptr.vmem [resolvable:$true] %s175_s28 }
   0xe   : > { %s1520_s30 = smov [#allocation7]   ;;  %s1361_s9 = scalar_lea.hbm %s1855_s1, 16384 }
   0xf   : > { %p1300_p9 = pneg %p1599_p8  ;;  %s191_s6 = sshll.u32 %s1520_s30, 4  ;;  %s1614_s6 = int_to_ptr.vmem [resolvable:$true] %s191_s6 }
  0x10   : > { %p1362_p12 = scmp.ne.s32.totalorder %s1855_s1, %s1361_s9  ;;  %p1368_p5 = scmp.lt.u32.totalorder %s1361_s9, %s1855_s1 }
  0x11   : > { %p1610_p11 = pnand %p1300_p9, %p1860_p1 }
  0x13   : > { %p1363_p13 = pneg %p1610_p11 }
  0x15   : > { %p1364_p0 = pnand %p1363_p13, %p1362_p12 }
  0x17   : > { %p1365_p3 = pneg %p1364_p0 }
  0x19   : > { %p1370_p7 = pnand %p1368_p5, %p1365_p3 }
  0x1b   : > { %1373 = shalt.err (!%p1370_p7)
}
  0x1c   : > { %s1374_s14 = scalar_lea.vmem %s1603_s28, 16384  ;;  %p1382_p2 = scmp.lt.s32.totalorder %s1603_s28, %s1603_s28 }
  0x1d   : > { %p1375_p9 = scmp.ne.s32.totalorder %s1603_s28, %s1374_s14  ;;  %p1383_p12 = scmp.lt.s32.totalorder %s1374_s14, %s1374_s14 }
  0x1f   : > { %p1377_p10 = pnand %p1375_p9, %p1363_p13  ;;  %p1384_p0 = por %p1383_p12, %p1382_p2 }
  0x21   : > { %p1378_p1 = pneg %p1377_p10 }
  0x23   : > { %p1385_p6 = pnand %p1384_p0, %p1378_p1 }
  0x25   : > { %1388 = shalt.err (!%p1385_p6)
}
  0x26   : > { %s1521_s15 = smov 256   ;;  %s1522_s16 = smov 16  }
  0x27   : > { %1303 = dma.hbm_to_vmem [thread:$0]  (!%p1610_p11), %s1855_s1, 16384, %s1603_s28, [#allocation6], %s1521_s15, %s1521_s15, %s1522_s16  }
  0x28   : > { %s1389_s7 = scalar_lea.hbm %s1857_s3, 16384 }
  0x29   : > { %p1390_p2 = scmp.ne.s32.totalorder %s1857_s3, %s1389_s7  ;;  %p1396_p10 = scmp.lt.u32.totalorder %s1389_s7, %s1857_s3 }
  0x2b   : > { %p1392_p1 = pnand %p1390_p2, %p1363_p13 }
  0x2d   : > { %p1393_p6 = pneg %p1392_p1 }
  0x2f   : > { %p1398_p3 = pnand %p1396_p10, %p1393_p6 }
  0x31   : > { %1401 = shalt.err (!%p1398_p3)
}
  0x32   : > { %s1402_s28 = scalar_lea.vmem %s1614_s6, 16384  ;;  %p1410_p12 = scmp.lt.s32.totalorder %s1614_s6, %s1614_s6 }
  0x33   : > { %p1403_p5 = scmp.ne.s32.totalorder %s1614_s6, %s1402_s28  ;;  %p1411_p0 = scmp.lt.s32.totalorder %s1402_s28, %s1402_s28 }
  0x35   : > { %p1405_p7 = pnand %p1403_p5, %p1363_p13  ;;  %p1412_p2 = por %p1411_p0, %p1410_p12 }
  0x37   : > { %p1406_p9 = pneg %p1405_p7 }
  0x39   : > { %p1413_p1 = pnand %p1412_p2, %p1406_p9 }
  0x3b   : > { %1416 = shalt.err (!%p1413_p1)
}
  0x3c   : > { %s1523_s12 = smov 512   ;;  %s1524_s13 = smov 32  }
  0x3d   : > { %1306 = dma.hbm_to_vmem [thread:$0]  (!%p1610_p11), %s1857_s3, 16384, %s1614_s6, [#allocation6], %s1523_s12, %s1523_s12, %s1524_s13  }
  0x3e   : > { %s1672_s16 = sadd.s32 1, %s1517_s21   ;;  %s29_s23 = sadd.s32 1, %s1513_s20 }
  0x3f   : > { %s26_s17 = ssub.s32 %s1517_s21, %s1672_s16  ;;  %p36_p6 = scmp.ne.s32.totalorder %s1513_s20, %s1509_s19 }
  0x40   : > { %p27_p13 = scmp.eq.s32.totalorder %s26_s17, 0  ;;  %p37_p10 = scmp.eq.s32.totalorder %s1517_s21, 0 }
  0x41   : > { %p1867_p5 = scmp.eq.s32.totalorder %s1580_s22, 1  ;;  %p1317_p9 = scmp.lt.s32.totalorder %s1517_s21, 2 }
  0x42   : > { %s1681_s27 = scalar_select %p27_p13, %s1513_s20, %s29_s23  }
  0x43   : > { %p38_p3 = por %p37_p10, %p36_p6  ;;  %p1685_p7 = por %p1867_p5, %p36_p6 }
  0x44   : > { %s208_s30 = sand.u32 1, %s1513_s20   ;;  %s1021_s6 = sshll.u32 %s1517_s21, 10 }
  0x45   : > { %s1868_s29 = scalar_select %p1685_p7, 1, 0 }
  0x46   : > { %s1005_s7 = sshll.u32 %s208_s30, 6  ;;  %s1695_s10 = scalar_lea.hbm %s1854_s0, %s1021_s6 }
  0x47   : > { %s212_s11 = scalar_lea.vmem [#allocation2], %s1005_s7  ;;  %p1699_p11 = pnand %p1317_p9, %p38_p3 }
  0x48   : > { %s220_s28 = sshll.u32 %s212_s11, 4  ;;  %s1703_s15 = scalar_lea.sflag [#allocation3], %s208_s30  ;;  %s1697_s28 = int_to_ptr.vmem [resolvable:$true] %s220_s28 }
  0x49   : > { %s1417_s17 = scalar_lea.hbm %s1695_s10, 1024  ;;  %p1419_p0 = pneg %p1699_p11 }
  0x4a   : > { %p1418_p12 = scmp.ne.s32.totalorder %s1695_s10, %s1417_s17  ;;  %s1422_s6 = scalar_lea.hbm %s1854_s0, 2048 }
  0x4b   : > { %p1423_p13 = scmp.lt.u32.totalorder %s1695_s10, %s1854_s0  ;;  %p1424_p6 = scmp.lt.u32.totalorder %s1422_s6, %s1417_s17 }
  0x4c   : > { %p1420_p2 = pnand %p1419_p0, %p1418_p12  ;;  %p1426_p3 = scmp.lt.u32.totalorder %s1417_s17, %s1695_s10 }
  0x4d   : > { %p1425_p10 = por %p1424_p6, %p1423_p13 }
  0x4e   : > { %p1421_p1 = pneg %p1420_p2 }
  0x4f   : > { %p1427_p5 = por %p1426_p3, %p1425_p10 }
  0x51   : > { %p1428_p9 = pnand %p1427_p5, %p1421_p1 }
  0x53   : > { %1431 = shalt.err (!%p1428_p9)
}
  0x54   : > { %s1432_s30 = scalar_lea.vmem %s1697_s28, 1024  ;;  %s1525_s11 = smov [#allocation2]  }
  0x55   : > { %p1433_p12 = scmp.ne.s32.totalorder %s1697_s28, %s1432_s30  ;;  %s1437_s23 = sshll.u32 %s1525_s11, 4  ;;  %s1438_s23 = int_to_ptr.vmem [resolvable:$false] %s1437_s23 }
  0x56   : > { %s1439_s7 = scalar_lea.vmem %s1438_s23, 2048  ;;  %p1440_p4 = scmp.lt.s32.totalorder %s1697_s28, %s1438_s23 }
  0x57   : > { %p1435_p2 = pnand %p1433_p12, %p1419_p0  ;;  %p1441_p13 = scmp.lt.s32.totalorder %s1439_s7, %s1432_s30 }
  0x59   : > { %p1436_p7 = pneg %p1435_p2  ;;  %p1442_p6 = por %p1441_p13, %p1440_p4 }
  0x5b   : > { %p1443_p10 = pnand %p1442_p6, %p1436_p7 }
  0x5d   : > { %1446 = shalt.err (!%p1443_p10)
}
  0x5e   : > { %1310 = dma.hbm_to_vmem [thread:$0]  (!%p1699_p11), %s1695_s10, 1024, %s1697_s28, %s1703_s15, %s1523_s12, %s1523_s12, %s1524_s13  }
  0x5f   : > { %232 = sbr.rel (%p1599_p8) target bundleno = 753 (0x2f1), region = 40  ;;  %s1737_s17 = sand.u32 (!%p1599_p8), 1, %s1509_s19  }
  0x60   : > { %s1010_s6 = sshll.u32 (!%p1599_p8), %s1737_s17, 6  ;;  %s235_s8 = scalar_lea.sflag (!%p1599_p8), [#allocation3], %s1737_s17 }
  0x61   : > { %s1743_s14 = scalar_lea.vmem (!%p1599_p8), [#allocation2], %s1010_s6  ;;  %p1870_p4 = scmp.ne.s32.totalorder (!%p1599_p8), %s1863_s24, 0 }
  0x66   : > { %1492 = dma.done.wait (%p1870_p4), %s235_s8, 1024  }
  0x67   : > { %1494 = vsyncadd (%p1870_p4), %s235_s8, 4294966272  ;;  %p1871_p7 = scmp.eq.s32.totalorder %s1580_s22, 0 }
  0x69   : > { %1496 = dma.done.wait (%p1871_p7), [#allocation6], 32768   ;;  %p1872_p8 = pmov %p1871_p7 }
  0x6a   : > { %v284_v0 = vld [vmem:[#allocation5 + $0x8] sm:$0xff]  ;;  %v286_v1 = vld [vmem:[#allocation5 + $0x18] sm:$0xff]  ;;  %v283_v2 = vld [vmem:[#allocation5] sm:$0xff]  ;;  %s272_s10 = scalar_lea.vmem [#allocation8], %s1010_s6  ;;  %s1023_s15 = sshll.u32 %s1580_s22, 10 }
  0x6b   : > { %1498 = vsyncadd (%p1872_p8), [#allocation6], 4294934528  ;;  %v1024_v3 = vpack.c.bf16 %v286_v1, %v284_v0  ;;  %v285_v4 = vld [vmem:[#allocation5 + $0x10] sm:$0xff]  ;;  %v288_v5 = vld [vmem:[#allocation5 + $0x28] sm:$0xff]  ;;  %s908_s28 = sshll.u32 %s272_s10, 4  ;;  %s1810_s11 = scalar_lea.hbm %s1859_s5, %s1023_s15  ;;  %s1805_s28 = int_to_ptr.vmem [resolvable:$true] %s908_s28 }
  0x6c   : > { %v290_v6 = vld [vmem:[#allocation5 + $0x38] sm:$0xff]  ;;  %v1026_v7 = vpack.c.bf16 %v285_v4, %v283_v2  ;;  %v287_v9 = vld [vmem:[#allocation5 + $0x20] sm:$0xff]  ;;  %v289_v10 = vld [vmem:[#allocation5 + $0x30] sm:$0xff]  ;;  %s894_s23 = scalar_lea.sflag [#allocation4], %s1737_s17  ;;  %s1447_s22 = scalar_lea.vmem %s1805_s28, 1024 }
  0x6d   : > { %v1028_v8 = vpack.c.bf16 %v290_v6, %v288_v5  ;;  %v292_v11 = vld [vmem:[#allocation5 + $0x48] sm:$0xff]  ;;  %1025 = vmatprep.subr.bf16.mxu0 %v1024_v3  ;;  %v294_v12 = vld [vmem:[#allocation5 + $0x58] sm:$0xff]  ;;  %v1030_v13 = vpack.c.bf16 %v289_v10, %v287_v9  ;;  %v291_v15 = vld [vmem:[#allocation5 + $0x40] sm:$0xff]  ;;  %p1448_p11 = scmp.ne.s32.totalorder %s1805_s28, %s1447_s22  ;;  %p1873_p0 = scmp.ne.s32.totalorder %s1868_s29, 0 }
  0x6e   : > { %1027 = vmatpush1.bf16.msra.mxu0 %v1026_v7  ;;  %v1032_v14 = vpack.c.bf16 %v294_v12, %v292_v11  ;;  %v293_v16 = vld [vmem:[#allocation5 + $0x50] sm:$0xff]  ;;  %v296_v17 = vld [vmem:[#allocation5 + $0x68] sm:$0xff]  ;;  %v298_v18 = vld [vmem:[#allocation5 + $0x78] sm:$0xff]  ;;  %s1526_s7 = smov [#allocation8]  }
  0x6f   : > { %1029 = vmatprep.subr.bf16.mxu0 %v1028_v8  ;;  %v1034_v19 = vpack.c.bf16 %v293_v16, %v291_v15  ;;  %v1036_v20 = vpack.c.bf16 %v298_v18, %v296_v17  ;;  %v295_v21 = vld [vmem:[#allocation5 + $0x60] sm:$0xff]  ;;  %v297_v22 = vld [vmem:[#allocation5 + $0x70] sm:$0xff]  ;;  %v300_v23 = vld [vmem:[#allocation5 + $0x88] sm:$0xff]  ;;  %p1449_p1 = pnand %p1448_p11, %p1873_p0  ;;  %s1451_s6 = sshll.u32 %s1526_s7, 4  ;;  %s1452_s6 = int_to_ptr.vmem [resolvable:$false] %s1451_s6 }
  0x70   : > { %v302_v24 = vld [vmem:[#allocation5 + $0x98] sm:$0xff]  ;;  %v1038_v25 = vpack.c.bf16 %v297_v22, %v295_v21  ;;  %v299_v27 = vld [vmem:[#allocation5 + $0x80] sm:$0xff]  ;;  %v301_v28 = vld [vmem:[#allocation5 + $0x90] sm:$0xff]  ;;  %s1453_s8 = scalar_lea.vmem %s1452_s6, 2048  ;;  %p1454_p5 = scmp.lt.s32.totalorder %s1805_s28, %s1452_s6 }
  0x71   : > { %v1040_v26 = vpack.c.bf16 %v302_v24, %v300_v23  ;;  %v304_v29 = vld [vmem:[#allocation5 + $0xa8] sm:$0xff]  ;;  %v306_v30 = vld [vmem:[#allocation5 + $0xb8] sm:$0xff]  ;;  %v1042_v31 = vpack.c.bf16 %v301_v28, %v299_v27  ;;  %v303_v33 = vld [vmem:[#allocation5 + $0xa0] sm:$0xff]  ;;  %p1450_p3 = pneg %p1449_p1  ;;  %p1455_p9 = scmp.lt.s32.totalorder %s1453_s8, %s1447_s22 }
  0x72   : > { %1031 = vmatpush1.bf16.msra.mxu0 %v1030_v13  ;;  %v1044_v32 = vpack.c.bf16 %v306_v30, %v304_v29  ;;  %v305_v34 = vld [vmem:[#allocation5 + $0xb0] sm:$0xff]  ;;  %v308_v35 = vld [vmem:[#allocation5 + $0xc8] sm:$0xff]  ;;  %v310_v36 = vld [vmem:[#allocation5 + $0xd8] sm:$0xff] }
  0x73   : > { %1033 = vmatprep.subr.bf16.mxu0 %v1032_v14  ;;  %v1046_v37 = vpack.c.bf16 %v305_v34, %v303_v33  ;;  %v1048_v38 = vpack.c.bf16 %v310_v36, %v308_v35  ;;  %v307_v39 = vld [vmem:[#allocation5 + $0xc0] sm:$0xff]  ;;  %v309_v40 = vld [vmem:[#allocation5 + $0xd0] sm:$0xff]  ;;  %v276_v41 = vld [vmem:[%s1743_s14 + $0x8] sm:$0xff]  ;;  %p1456_p12 = por %p1455_p9, %p1454_p5 }
  0x74   : > { %v312_v42 = vld [vmem:[#allocation5 + $0xe8] sm:$0xff]  ;;  %v314_v43 = vld [vmem:[#allocation5 + $0xf8] sm:$0xff]  ;;  %487 = vmatprep.mubr.f32.mxu0 %v276_v41  ;;  %v1050_v44 = vpack.c.bf16 %v309_v40, %v307_v39  ;;  %v311_v46 = vld [vmem:[#allocation5 + $0xe0] sm:$0xff] }
  0x75   : > { %v1052_v45 = vpack.c.bf16 %v314_v43, %v312_v42  ;;  %v313_v47 = vld [vmem:[#allocation5 + $0xf0] sm:$0xff]  ;;  %v316_v48 = vld [vmem:[#allocation5 + $0x108] sm:$0xff]  ;;  %v318_v49 = vld [vmem:[#allocation5 + $0x118] sm:$0xff]  ;;  %p1457_p2 = pnand %p1456_p12, %p1450_p3 }
  0x76   : > { %1035 = vmatpush1.bf16.msra.mxu0 %v1034_v19  ;;  %v1054_v50 = vpack.c.bf16 %v313_v47, %v311_v46  ;;  %v1056_v51 = vpack.c.bf16 %v318_v49, %v316_v48  ;;  %v315_v52 = vld [vmem:[#allocation5 + $0x100] sm:$0xff]  ;;  %v317_v53 = vld [vmem:[#allocation5 + $0x110] sm:$0xff]  ;;  %v320_v54 = vld [vmem:[#allocation5 + $0x128] sm:$0xff] }
  0x77   : > { %1037 = vmatprep.subr.bf16.mxu0 %v1036_v20  ;;  %v322_v55 = vld [vmem:[#allocation5 + $0x138] sm:$0xff]  ;;  %v1058_v56 = vpack.c.bf16 %v317_v53, %v315_v52  ;;  %v319_v58 = vld [vmem:[#allocation5 + $0x120] sm:$0xff]  ;;  %v321_v59 = vld [vmem:[#allocation5 + $0x130] sm:$0xff] }
  0x78   : > { %v1060_v57 = vpack.c.bf16 %v322_v55, %v320_v54  ;;  %v324_v60 = vld [vmem:[#allocation5 + $0x148] sm:$0xff]  ;;  %v326_v61 = vld [vmem:[#allocation5 + $0x158] sm:$0xff]  ;;  %v1062_v62 = vpack.c.bf16 %v321_v59, %v319_v58  ;;  %v323_v0 = vld [vmem:[#allocation5 + $0x140] sm:$0xff] }
  0x79   : > { %v1064_v63 = vpack.c.bf16 %v326_v61, %v324_v60  ;;  %v325_v1 = vld [vmem:[#allocation5 + $0x150] sm:$0xff]  ;;  %v328_v2 = vld [vmem:[#allocation5 + $0x168] sm:$0xff]  ;;  %v330_v3 = vld [vmem:[#allocation5 + $0x178] sm:$0xff] }
  0x7a   : > { %1039 = vmatpush1.bf16.msra.mxu0 %v1038_v25  ;;  %v1066_v4 = vpack.c.bf16 %v325_v1, %v323_v0  ;;  %v1068_v5 = vpack.c.bf16 %v330_v3, %v328_v2  ;;  %v327_v6 = vld [vmem:[#allocation5 + $0x160] sm:$0xff]  ;;  %v329_v7 = vld [vmem:[#allocation5 + $0x170] sm:$0xff]  ;;  %v332_v8 = vld [vmem:[#allocation5 + $0x188] sm:$0xff] }
  0x7b   : > { %1041 = vmatprep.subr.bf16.mxu0 %v1040_v26  ;;  %v334_v9 = vld [vmem:[#allocation5 + $0x198] sm:$0xff]  ;;  %v1070_v10 = vpack.c.bf16 %v329_v7, %v327_v6  ;;  %v331_v11 = vld [vmem:[#allocation5 + $0x180] sm:$0xff]  ;;  %v333_v12 = vld [vmem:[#allocation5 + $0x190] sm:$0xff] }
  0x7c   : > { %v336_v13 = vld [vmem:[#allocation5 + $0x1a8] sm:$0xff]  ;;  %v1072_v14 = vpack.c.bf16 %v334_v9, %v332_v8  ;;  %v338_v15 = vld [vmem:[#allocation5 + $0x1b8] sm:$0xff]  ;;  %v581_v19 = vld [vmem:[#allocation7] sm:$0xff]  ;;  %v1074_v26 = vpack.c.bf16 %v333_v12, %v331_v11 }
  0x7d   : > { %v582_v16 = vld [vmem:[#allocation7 + $0x8] sm:$0xff]  ;;  %v585_v20 = vld [vmem:[#allocation7 + $0x20] sm:$0xff]  ;;  %v1076_v30 = vpack.c.bf16 %v338_v15, %v336_v13  ;;  %v342_v35 = vld [vmem:[#allocation5 + $0x1d8] sm:$0xff] }
  0x7e   : > { %1043 = vmatpush1.bf16.msra.mxu0 %v1042_v31  ;;  %v586_v17 = vld [vmem:[#allocation7 + $0x28] sm:$0xff]  ;;  %v1154_v22 = vpack.c.bf16 %v585_v20, %v581_v19  ;;  %v589_v24 = vld [vmem:[#allocation7 + $0x40] sm:$0xff]  ;;  %v346_v47 = vld [vmem:[#allocation5 + $0x1f8] sm:$0xff] }
  0x7f   : > { %1045 = vmatprep.subr.bf16.mxu0 %v1044_v32  ;;  %v1152_v18 = vpack.c.bf16 %v586_v17, %v582_v16  ;;  %v590_v21 = vld [vmem:[#allocation7 + $0x48] sm:$0xff]  ;;  %v593_v25 = vld [vmem:[#allocation7 + $0x60] sm:$0xff]  ;;  %v337_v32 = vld [vmem:[#allocation5 + $0x1b0] sm:$0xff] }
  0x80   : > { %v594_v23 = vld [vmem:[#allocation7 + $0x68] sm:$0xff]  ;;  %v335_v31 = vld [vmem:[#allocation5 + $0x1a0] sm:$0xff]  ;;  %v1158_v34 = vpack.c.bf16 %v593_v25, %v589_v24  ;;  %v350_v59 = vld [vmem:[#allocation5 + $0x218] sm:$0xff] }
  0x81   : > { %1153 = vmatprep.subr.bf16.mxu1 %v1152_v18  ;;  %v1156_v27 = vpack.c.bf16 %v594_v23, %v590_v21  ;;  %v598_v28 = vld [vmem:[#allocation7 + $0x88] sm:$0xff]  ;;  %v1078_v41 = vpack.c.bf16 %v337_v32, %v335_v31  ;;  %v339_v43 = vld [vmem:[#allocation5 + $0x1c0] sm:$0xff]  ;;  %v354_v7 = vld [vmem:[#allocation5 + $0x238] sm:$0xff] }
  0x82   : > { %1047 = vmatpush1.bf16.msra.mxu0 %v1046_v37  ;;  %v602_v29 = vld [vmem:[#allocation7 + $0xa8] sm:$0xff]  ;;  %1155 = vmatpush1.bf16.msra.mxu1 %v1154_v22  ;;  %v597_v37 = vld [vmem:[#allocation7 + $0x80] sm:$0xff]  ;;  %v353_v17 = vld [vmem:[#allocation5 + $0x230] sm:$0xff] }
  0x83   : > { %1049 = vmatprep.subr.bf16.mxu0 %v1048_v38  ;;  %v340_v33 = vld [vmem:[#allocation5 + $0x1c8] sm:$0xff]  ;;  %1157 = vmatprep.subr.bf16.mxu1 %v1156_v27  ;;  %v1160_v36 = vpack.c.bf16 %v602_v29, %v598_v28  ;;  %v601_v38 = vld [vmem:[#allocation7 + $0xa0] sm:$0xff]  ;;  %v358_v21 = vld [vmem:[#allocation5 + $0x258] sm:$0xff] }
  0x84   : > { %v606_v39 = vld [vmem:[#allocation7 + $0xc8] sm:$0xff]  ;;  %v1080_v42 = vpack.c.bf16 %v342_v35, %v340_v33  ;;  %v1162_v46 = vpack.c.bf16 %v601_v38, %v597_v37  ;;  %v605_v49 = vld [vmem:[#allocation7 + $0xc0] sm:$0xff]  ;;  %v357_v31 = vld [vmem:[#allocation5 + $0x250] sm:$0xff] }
  0x85   : > { %v610_v40 = vld [vmem:[#allocation7 + $0xe8] sm:$0xff]  ;;  %v343_v55 = vld [vmem:[#allocation5 + $0x1e0] sm:$0xff]  ;;  %v278_v33 = vld [vmem:[%s1743_s14 + $0x18] sm:$0xff] }
  0x86   : > { %1051 = vmatpush1.bf16.msra.mxu0 %v1050_v44  ;;  %v341_v44 = vld [vmem:[#allocation5 + $0x1d0] sm:$0xff]  ;;  %1159 = vmatpush1.bf16.msra.mxu1 %v1158_v34  ;;  %v1164_v48 = vpack.c.bf16 %v610_v40, %v606_v39  ;;  %v618_v52 = vld [vmem:[#allocation7 + $0x128] sm:$0xff]  ;;  %v613_v61 = vld [vmem:[#allocation7 + $0x100] sm:$0xff] }
  0x87   : > { %1053 = vmatprep.subr.bf16.mxu0 %v1052_v45  ;;  %v344_v45 = vld [vmem:[#allocation5 + $0x1e8] sm:$0xff]  ;;  %1161 = vmatprep.subr.bf16.mxu1 %v1160_v36  ;;  %v1082_v53 = vpack.c.bf16 %v341_v44, %v339_v43  ;;  %v347_v3 = vld [vmem:[#allocation5 + $0x200] sm:$0xff]  ;;  %v362_v35 = vld [vmem:[#allocation5 + $0x278] sm:$0xff] }
  0x88   : > { %v1084_v54 = vpack.c.bf16 %v346_v47, %v344_v45  ;;  %v626_v0 = vld [vmem:[#allocation7 + $0x168] sm:$0xff]  ;;  %v621_v9 = vld [vmem:[#allocation7 + $0x140] sm:$0xff]  ;;  %v361_v44 = vld [vmem:[#allocation5 + $0x270] sm:$0xff] }
  0x89   : > { %v630_v11 = vld [vmem:[#allocation7 + $0x188] sm:$0xff]  ;;  %v275_v13 = vld [vmem:[%s1743_s14] sm:$0xff]  ;;  %v366_v47 = vld [vmem:[#allocation5 + $0x298] sm:$0xff] }
  0x8a   : > { %1055 = vmatpush1.bf16.msra.mxu0 %v1054_v50  ;;  %v609_v50 = vld [vmem:[#allocation7 + $0xe0] sm:$0xff]  ;;  %1163 = vmatpush1.bf16.msra.mxu1 %v1162_v46  ;;  %v634_v12 = vld [vmem:[#allocation7 + $0x1a8] sm:$0xff] }
  0x8b   : > { %1057 = vmatprep.subr.bf16.mxu0 %v1056_v51  ;;  %v614_v51 = vld [vmem:[#allocation7 + $0x108] sm:$0xff]  ;;  %v1166_v58 = vpack.c.bf16 %v609_v50, %v605_v49  ;;  %1165 = vmatprep.subr.bf16.mxu1 %v1164_v48  ;;  %v351_v15 = vld [vmem:[#allocation5 + $0x220] sm:$0xff]  ;;  %v1176_v22 = vpack.c.bf16 %v634_v12, %v630_v11 }
  0x8c   : > { %v1168_v60 = vpack.c.bf16 %v618_v52, %v614_v51  ;;  %v356_v18 = vld [vmem:[#allocation5 + $0x248] sm:$0xff]  ;;  %v629_v23 = vld [vmem:[#allocation7 + $0x180] sm:$0xff]  ;;  %v1094_v27 = vpack.c.bf16 %v353_v17, %v351_v15 }
  0x8d   : > { %v280_v19 = vld [vmem:[%s1743_s14 + $0x28] sm:$0xff]  ;;  %v633_v24 = vld [vmem:[#allocation7 + $0x1a0] sm:$0xff] }
  0x8e   : > { %1059 = vmatpush1.bf16.msra.mxu0 %v1058_v56  ;;  %v345_v56 = vld [vmem:[#allocation5 + $0x1f0] sm:$0xff]  ;;  %1167 = vmatpush1.bf16.msra.mxu1 %v1166_v58  ;;  %v638_v25 = vld [vmem:[#allocation7 + $0x1c8] sm:$0xff]  ;;  %v355_v28 = vld [vmem:[#allocation5 + $0x240] sm:$0xff]  ;;  %v1178_v34 = vpack.c.bf16 %v633_v24, %v629_v23 }
  0x8f   : > { %1061 = vmatprep.subr.bf16.mxu0 %v1060_v57  ;;  %v348_v57 = vld [vmem:[#allocation5 + $0x208] sm:$0xff]  ;;  %v1086_v1 = vpack.c.bf16 %v345_v56, %v343_v55  ;;  %1169 = vmatprep.subr.bf16.mxu1 %v1168_v60  ;;  %v279_v29 = vld [vmem:[%s1743_s14 + $0x20] sm:$0xff]  ;;  %v365_v56 = vld [vmem:[#allocation5 + $0x290] sm:$0xff] }
  0x90   : > { %v1088_v2 = vpack.c.bf16 %v350_v59, %v348_v57  ;;  %v360_v32 = vld [vmem:[#allocation5 + $0x268] sm:$0xff]  ;;  %v637_v37 = vld [vmem:[#allocation7 + $0x1c0] sm:$0xff]  ;;  %v370_v59 = vld [vmem:[#allocation5 + $0x2b8] sm:$0xff] }
  0x91   : > { %v641_v38 = vld [vmem:[#allocation7 + $0x1e0] sm:$0xff]  ;;  %v646_v39 = vld [vmem:[#allocation7 + $0x208] sm:$0xff] }
  0x92   : > { %1063 = vmatpush1.bf16.msra.mxu0 %v1062_v62  ;;  %v617_v62 = vld [vmem:[#allocation7 + $0x120] sm:$0xff]  ;;  %v650_v40 = vld [vmem:[#allocation7 + $0x228] sm:$0xff]  ;;  %v1182_v46 = vpack.c.bf16 %v641_v38, %v637_v37 }
  0x93   : > { %1065 = vmatprep.subr.bf16.mxu0 %v1064_v63  ;;  %v622_v63 = vld [vmem:[#allocation7 + $0x148] sm:$0xff]  ;;  %v1170_v6 = vpack.c.bf16 %v617_v62, %v613_v61  ;;  %v359_v43 = vld [vmem:[#allocation5 + $0x260] sm:$0xff]  ;;  %v1184_v48 = vpack.c.bf16 %v650_v40, %v646_v39  ;;  %v381_v40 = vld [vmem:[#allocation5 + $0x310] sm:$0xff] }
  0x94   : > { %v1172_v8 = vpack.c.bf16 %v626_v0, %v622_v63  ;;  %v364_v45 = vld [vmem:[#allocation5 + $0x288] sm:$0xff]  ;;  %v645_v49 = vld [vmem:[#allocation7 + $0x200] sm:$0xff] }
  0x95   : > { %1171 = vmatpush1.bf16.msra.mxu1 %v1170_v6  ;;  %v649_v50 = vld [vmem:[#allocation7 + $0x220] sm:$0xff]  ;;  %v654_v51 = vld [vmem:[#allocation7 + $0x248] sm:$0xff] }
  0x96   : > { %1067 = vmatpush1.bf16.msra.mxu0 %v1066_v4  ;;  %v349_v4 = vld [vmem:[#allocation5 + $0x210] sm:$0xff]  ;;  %1173 = vmatprep.subr.bf16.mxu1 %v1172_v8  ;;  %v658_v52 = vld [vmem:[#allocation7 + $0x268] sm:$0xff]  ;;  %v363_v55 = vld [vmem:[#allocation5 + $0x280] sm:$0xff]  ;;  %v1186_v58 = vpack.c.bf16 %v649_v50, %v645_v49 }
  0x97   : > { %1069 = vmatprep.subr.bf16.mxu0 %v1068_v5  ;;  %v352_v5 = vld [vmem:[#allocation5 + $0x228] sm:$0xff]  ;;  %v1188_v60 = vpack.c.bf16 %v658_v52, %v654_v51  ;;  %v653_v61 = vld [vmem:[#allocation7 + $0x240] sm:$0xff]  ;;  %v385_v52 = vld [vmem:[#allocation5 + $0x330] sm:$0xff] }
  0x98   : > { %v1092_v16 = vpack.c.bf16 %v354_v7, %v352_v5  ;;  %v368_v57 = vld [vmem:[#allocation5 + $0x2a8] sm:$0xff]  ;;  %v657_v62 = vld [vmem:[#allocation7 + $0x260] sm:$0xff]  ;;  %v374_v7 = vld [vmem:[#allocation5 + $0x2d8] sm:$0xff] }
  0x99   : > { %v662_v63 = vld [vmem:[#allocation7 + $0x288] sm:$0xff]  ;;  %v1190_v6 = vpack.c.bf16 %v657_v62, %v653_v61  ;;  %v371_v15 = vld [vmem:[#allocation5 + $0x2c0] sm:$0xff]  ;;  %v389_v62 = vld [vmem:[#allocation5 + $0x350] sm:$0xff] }
  0x9a   : > { %1071 = vmatpush1.bf16.msra.mxu0 %v1070_v10  ;;  %v625_v10 = vld [vmem:[#allocation7 + $0x160] sm:$0xff]  ;;  %v666_v0 = vld [vmem:[#allocation7 + $0x2a8] sm:$0xff] }
  0x9b   : > { %1073 = vmatprep.subr.bf16.mxu0 %v1072_v14  ;;  %v1090_v14 = vpack.c.bf16 %v349_v4, %v347_v3  ;;  %v1174_v20 = vpack.c.bf16 %v625_v10, %v621_v9  ;;  %v367_v3 = vld [vmem:[#allocation5 + $0x2a0] sm:$0xff]  ;;  %v369_v4 = vld [vmem:[#allocation5 + $0x2b0] sm:$0xff]  ;;  %v372_v5 = vld [vmem:[#allocation5 + $0x2c8] sm:$0xff]  ;;  %v1192_v8 = vpack.c.bf16 %v666_v0, %v662_v63 }
  0x9c   : > { %v661_v9 = vld [vmem:[#allocation7 + $0x280] sm:$0xff]  ;;  %v670_v11 = vld [vmem:[#allocation7 + $0x2c8] sm:$0xff] }
  0x9d   : > { %1175 = vmatpush1.bf16.msra.mxu1 %v1174_v20  ;;  %v665_v10 = vld [vmem:[#allocation7 + $0x2a0] sm:$0xff]  ;;  %v674_v12 = vld [vmem:[#allocation7 + $0x2e8] sm:$0xff] }
  0x9e   : > { %1075 = vmatpush1.bf16.msra.mxu0 %v1074_v26  ;;  %v642_v26 = vld [vmem:[#allocation7 + $0x1e8] sm:$0xff]  ;;  %1177 = vmatprep.subr.bf16.mxu1 %v1176_v22  ;;  %v1196_v20 = vpack.c.bf16 %v674_v12, %v670_v11  ;;  %v673_v22 = vld [vmem:[#allocation7 + $0x2e0] sm:$0xff]  ;;  %v397_v11 = vld [vmem:[#allocation5 + $0x390] sm:$0xff] }
  0x9f   : > { %1077 = vmatprep.subr.bf16.mxu0 %v1076_v30  ;;  %v1096_v30 = vpack.c.bf16 %v358_v21, %v356_v18  ;;  %v1180_v36 = vpack.c.bf16 %v642_v26, %v638_v25  ;;  %v376_v17 = vld [vmem:[#allocation5 + $0x2e8] sm:$0xff]  ;;  %v1194_v18 = vpack.c.bf16 %v665_v10, %v661_v9  ;;  %v669_v21 = vld [vmem:[#allocation7 + $0x2c0] sm:$0xff] }
  0xa0   : > { %v678_v23 = vld [vmem:[#allocation7 + $0x308] sm:$0xff]  ;;  %v379_v39 = vld [vmem:[#allocation5 + $0x300] sm:$0xff] }
  0xa1   : > { %1179 = vmatpush1.bf16.msra.mxu1 %v1178_v34  ;;  %v682_v24 = vld [vmem:[#allocation7 + $0x328] sm:$0xff]  ;;  %v681_v34 = vld [vmem:[#allocation7 + $0x320] sm:$0xff]  ;;  %v1122_v49 = vpack.c.bf16 %v381_v40, %v379_v39  ;;  %v584_v40 = vld [vmem:[#allocation7 + $0x18] sm:$0xff] }
  0xa2   : > { %1079 = vmatpush1.bf16.msra.mxu0 %v1078_v41  ;;  %v1098_v41 = vpack.c.bf16 %v357_v31, %v355_v28  ;;  %1181 = vmatprep.subr.bf16.mxu1 %v1180_v36  ;;  %v377_v28 = vld [vmem:[#allocation5 + $0x2f0] sm:$0xff]  ;;  %v382_v31 = vld [vmem:[#allocation5 + $0x318] sm:$0xff]  ;;  %v690_v36 = vld [vmem:[#allocation7 + $0x368] sm:$0xff] }
  0xa3   : > { %1081 = vmatprep.subr.bf16.mxu0 %v1080_v42  ;;  %v1100_v42 = vpack.c.bf16 %v362_v35, %v360_v32  ;;  %v1200_v32 = vpack.c.bf16 %v682_v24, %v678_v23  ;;  %v686_v35 = vld [vmem:[#allocation7 + $0x348] sm:$0xff]  ;;  %v383_v51 = vld [vmem:[#allocation5 + $0x320] sm:$0xff]  ;;  %v405_v23 = vld [vmem:[#allocation5 + $0x3d0] sm:$0xff] }
  0xa4   : > { %v387_v61 = vld [vmem:[#allocation5 + $0x340] sm:$0xff]  ;;  %v392_v0 = vld [vmem:[#allocation5 + $0x368] sm:$0xff] }
  0xa5   : > { %1183 = vmatpush1.bf16.msra.mxu1 %v1182_v46  ;;  %v689_v46 = vld [vmem:[#allocation7 + $0x360] sm:$0xff]  ;;  %v400_v12 = vld [vmem:[#allocation5 + $0x3a8] sm:$0xff] }
  0xa6   : > { %1083 = vmatpush1.bf16.msra.mxu0 %v1082_v53  ;;  %v1102_v53 = vpack.c.bf16 %v361_v44, %v359_v43  ;;  %1185 = vmatprep.subr.bf16.mxu1 %v1184_v48  ;;  %v386_v43 = vld [vmem:[#allocation5 + $0x338] sm:$0xff]  ;;  %v1204_v44 = vpack.c.bf16 %v690_v36, %v686_v35  ;;  %v698_v48 = vld [vmem:[#allocation7 + $0x3a8] sm:$0xff]  ;;  %v395_v10 = vld [vmem:[#allocation5 + $0x380] sm:$0xff] }
  0xa7   : > { %1085 = vmatprep.subr.bf16.mxu0 %v1084_v54  ;;  %v1104_v54 = vpack.c.bf16 %v366_v47, %v364_v45  ;;  %v685_v45 = vld [vmem:[#allocation7 + $0x340] sm:$0xff]  ;;  %v694_v47 = vld [vmem:[#allocation7 + $0x388] sm:$0xff] }
  0xa8   : > { %v408_v24 = vld [vmem:[#allocation5 + $0x3e8] sm:$0xff] }
  0xa9   : > { %1187 = vmatpush1.bf16.msra.mxu1 %v1186_v58  ;;  %v697_v58 = vld [vmem:[#allocation7 + $0x3a0] sm:$0xff]  ;;  %v706_v35 = vld [vmem:[#allocation7 + $0x3e8] sm:$0xff] }
  0xaa   : > { %1087 = vmatpush1.bf16.msra.mxu0 %v1086_v1  ;;  %v1106_v1 = vpack.c.bf16 %v365_v56, %v363_v55  ;;  %1189 = vmatprep.subr.bf16.mxu1 %v1188_v60  ;;  %v390_v55 = vld [vmem:[#allocation5 + $0x358] sm:$0xff]  ;;  %v1208_v56 = vpack.c.bf16 %v698_v48, %v694_v47 }
  0xab   : > { %1089 = vmatprep.subr.bf16.mxu0 %v1088_v2  ;;  %v1108_v2 = vpack.c.bf16 %v370_v59, %v368_v57  ;;  %v693_v57 = vld [vmem:[#allocation7 + $0x380] sm:$0xff]  ;;  %v1126_v59 = vpack.c.bf16 %v385_v52, %v383_v51 }
  0xac   : > { %v1210_v63 = vpack.c.bf16 %v697_v58, %v693_v57  ;;  %v596_v57 = vld [vmem:[#allocation7 + $0x78] sm:$0xff] }
  0xad   : > { %488 = vmatmul.mubr.f32.vlgmr.msra.gmra.mrb[0].mxu0 %v275_v13  ;;  %v1110_v13 = vpack.c.bf16 %v369_v4, %v367_v3  ;;  %1191 = vmatpush1.bf16.msra.mxu1 %v1190_v6  ;;  %v391_v4 = vld [vmem:[#allocation5 + $0x360] sm:$0xff]  ;;  %v396_v6 = vld [vmem:[#allocation5 + $0x388] sm:$0xff] }
  0xae   : > { %1091 = vmatpush1.bf16.msra.mxu0 %v1090_v14  ;;  %493 = vmatprep.mubr.f32.mxu0 %v280_v19  ;;  %v1112_v14 = vpack.c.bf16 %v374_v7, %v372_v5  ;;  %v378_v19 = vld [vmem:[#allocation5 + $0x2f8] sm:$0xff]  ;;  %v393_v5 = vld [vmem:[#allocation5 + $0x370] sm:$0xff] }
  0xaf   : > { %1093 = vmatprep.subr.bf16.mxu0 %v1092_v16  ;;  %v373_v16 = vld [vmem:[#allocation5 + $0x2d0] sm:$0xff]  ;;  %1193 = vmatprep.subr.bf16.mxu1 %v1192_v8  ;;  %v1116_v26 = vpack.c.bf16 %v378_v19, %v376_v17  ;;  %v398_v7 = vld [vmem:[#allocation5 + $0x398] sm:$0xff]  ;;  %v1134_v8 = vpack.c.bf16 %v393_v5, %v391_v4 }
  0xb0   : > { %v1114_v25 = vpack.c.bf16 %v373_v16, %v371_v15  ;;  %v1136_v9 = vpack.c.bf16 %v398_v7, %v396_v6  ;;  %v399_v16 = vld [vmem:[#allocation5 + $0x3a0] sm:$0xff]  ;;  %v401_v17 = vld [vmem:[#allocation5 + $0x3b0] sm:$0xff]  ;;  %v406_v19 = vld [vmem:[#allocation5 + $0x3d8] sm:$0xff] }
  0xb1   : > { %494 = vmatmul.mubr.f32.gmra.mrb[2].mxu0 %v279_v29  ;;  %v380_v29 = vld [vmem:[#allocation5 + $0x308] sm:$0xff]  ;;  %1195 = vmatpush1.bf16.msra.mxu1 %v1194_v18  ;;  %v600_v4 = vld [vmem:[#allocation7 + $0x98] sm:$0xff] }
  0xb2   : > { %1095 = vmatpush1.bf16.msra.mxu0 %v1094_v27  ;;  %564 = vmatprep.mubr.f32.mxu0 %v278_v33  ;;  %v375_v27 = vld [vmem:[#allocation5 + $0x2e0] sm:$0xff]  ;;  %v1120_v38 = vpack.c.bf16 %v382_v31, %v380_v29  ;;  %v404_v18 = vld [vmem:[#allocation5 + $0x3c8] sm:$0xff]  ;;  %v409_v29 = vld [vmem:[#allocation5 + $0x3f0] sm:$0xff] }
  0xb3   : > { %1097 = vmatprep.subr.bf16.mxu0 %v1096_v30  ;;  %v1198_v30 = vpack.c.bf16 %v673_v22, %v669_v21  ;;  %1197 = vmatprep.subr.bf16.mxu1 %v1196_v20  ;;  %v677_v33 = vld [vmem:[#allocation7 + $0x300] sm:$0xff]  ;;  %v1118_v37 = vpack.c.bf16 %v377_v28, %v375_v27  ;;  %v1142_v20 = vpack.c.bf16 %v401_v17, %v399_v16  ;;  %v277_v31 = vld [vmem:[%s1743_s14 + $0x10] sm:$0xff]  ;;  %v604_v5 = vld [vmem:[#allocation7 + $0xb8] sm:$0xff] }
  0xb4   : > { %v1144_v21 = vpack.c.bf16 %v406_v19, %v404_v18  ;;  %v403_v22 = vld [vmem:[#allocation5 + $0x3c0] sm:$0xff]  ;;  %v607_v16 = vld [vmem:[#allocation7 + $0xd0] sm:$0xff]  ;;  %v616_v18 = vld [vmem:[#allocation7 + $0x118] sm:$0xff] }
  0xb5   : > { %1199 = vmatpush1.bf16.msra.mxu1 %v1198_v30  ;;  %v407_v28 = vld [vmem:[#allocation5 + $0x3e0] sm:$0xff]  ;;  %v611_v17 = vld [vmem:[#allocation7 + $0xf0] sm:$0xff]  ;;  %v620_v19 = vld [vmem:[#allocation7 + $0x138] sm:$0xff] }
  0xb6   : > { %1099 = vmatpush1.bf16.msra.mxu0 %v1098_v41  ;;  %v384_v41 = vld [vmem:[#allocation5 + $0x328] sm:$0xff]  ;;  %1201 = vmatprep.subr.bf16.mxu1 %v1200_v32  ;;  %v1150_v30 = vpack.c.bf16 %v409_v29, %v407_v28  ;;  %v282_v32 = vld [vmem:[%s1743_s14 + $0x38] sm:$0xff]  ;;  %v623_v28 = vld [vmem:[#allocation7 + $0x150] sm:$0xff] }
  0xb7   : > { %1101 = vmatprep.subr.bf16.mxu0 %v1100_v42  ;;  %v1202_v42 = vpack.c.bf16 %v681_v34, %v677_v33  ;;  %v1124_v50 = vpack.c.bf16 %v386_v43, %v384_v41  ;;  %v281_v33 = vld [vmem:[%s1743_s14 + $0x30] sm:$0xff]  ;;  %v702_v34 = vld [vmem:[#allocation7 + $0x3c8] sm:$0xff]  ;;  %v588_v41 = vld [vmem:[#allocation7 + $0x38] sm:$0xff]  ;;  %v413_v43 = vlaneseq }
  0xb8   : > { %v1212_v36 = vpack.c.bf16 %v706_v35, %v702_v34  ;;  %v627_v29 = vld [vmem:[#allocation7 + $0x170] sm:$0xff] }
  0xb9   : > { %1203 = vmatpush1.bf16.msra.mxu1 %v1202_v42  ;;  %v1216_v42 = vpack.c.bf16 %v588_v41, %v584_v40  ;;  %v631_v34 = vld [vmem:[#allocation7 + $0x190] sm:$0xff] }
  0xba   : > { %1103 = vmatpush1.bf16.msra.mxu0 %v1102_v53  ;;  %v388_v53 = vld [vmem:[#allocation5 + $0x348] sm:$0xff]  ;;  %1205 = vmatprep.subr.bf16.mxu1 %v1204_v44  ;;  %v1761_v44 = vshrl.u32 %v413_v43, 7  ;;  %v635_v35 = vld [vmem:[#allocation7 + $0x1b0] sm:$0xff]  ;;  %v652_v43 = vld [vmem:[#allocation7 + $0x238] sm:$0xff] }
  0xbb   : > { %1105 = vmatprep.subr.bf16.mxu0 %v1104_v54  ;;  %v1206_v54 = vpack.c.bf16 %v689_v46, %v685_v45  ;;  %v1128_v60 = vpack.c.bf16 %v390_v55, %v388_v53  ;;  %v411_v46 = vld [vmem:[%s1856_s2] sm:$0x3]  ;;  %v583_v53 = vld [vmem:[#allocation7 + $0x10] sm:$0xff] }
  0xbc   : > { %v415_v45 = vsub.s32 0, %v1761_v44  ;;  %v419_v47 = vsub.s32 1, %v1761_v44  ;;  %v639_v40 = vld [vmem:[#allocation7 + $0x1d0] sm:$0xff] }
  0xbd   : > { %1207 = vmatpush1.bf16.msra.mxu1 %v1206_v54  ;;  %v587_v54 = vld [vmem:[#allocation7 + $0x30] sm:$0xff] }
  0xbe   : > { %1107 = vmatpush1.bf16.msra.mxu0 %v1106_v1  ;;  %v394_v1 = vld [vmem:[#allocation5 + $0x378] sm:$0xff]  ;;  %1209 = vmatprep.subr.bf16.mxu1 %v1208_v56  ;;  %v416_v48 = vrot.slane %v411_v46, %v415_v45  ;;  %v643_v41 = vld [vmem:[#allocation7 + $0x1f0] sm:$0xff] }
  0xbf   : > { %1109 = vmatprep.subr.bf16.mxu0 %v1108_v2  ;;  %v1130_v2 = vpack.c.bf16 %v389_v62, %v387_v61  ;;  %v1132_v3 = vpack.c.bf16 %v394_v1, %v392_v0  ;;  %v592_v56 = vld [vmem:[#allocation7 + $0x58] sm:$0xff]  ;;  %v591_v1 = vld [vmem:[#allocation7 + $0x50] sm:$0xff] }
  0xc0   : > { %v1220_v0 = vpack.c.bf16 %v596_v57, %v592_v56  ;;  %v655_v56 = vld [vmem:[#allocation7 + $0x250] sm:$0xff] }
  0xc1   : > { %1211 = vmatpush1.bf16.msra.mxu1 %v1210_v63  ;;  %v659_v57 = vld [vmem:[#allocation7 + $0x270] sm:$0xff] }
  0xc2   : > { %1111 = vmatpush1.bf16.msra.mxu0 %v1110_v13  ;;  %v402_v13 = vld [vmem:[#allocation5 + $0x3b8] sm:$0xff]  ;;  %1213 = vmatprep.subr.bf16.mxu1 %v1212_v36 }
  0xc3   : > { %1113 = vmatprep.subr.bf16.mxu0 %v1112_v14  ;;  %v1138_v14 = vpack.c.bf16 %v397_v11, %v395_v10  ;;  %v1140_v15 = vpack.c.bf16 %v402_v13, %v400_v12  ;;  %v599_v10 = vld [vmem:[#allocation7 + $0x90] sm:$0xff]  ;;  %v608_v12 = vld [vmem:[#allocation7 + $0xd8] sm:$0xff] }
  0xc4   : > { %v603_v11 = vld [vmem:[#allocation7 + $0xb0] sm:$0xff]  ;;  %v612_v13 = vld [vmem:[#allocation7 + $0xf8] sm:$0xff] }
  0xc5   : > { %v640_v36 = vld [vmem:[#allocation7 + $0x1d8] sm:$0xff] }
  0xc6   : > { %1115 = vmatpush1.bf16.msra.mxu0 %v1114_v25  ;;  %v410_v25 = vld [vmem:[#allocation5 + $0x3f8] sm:$0xff] }
  0xc7   : > { %1117 = vmatprep.subr.bf16.mxu0 %v1116_v26  ;;  %v1146_v26 = vpack.c.bf16 %v405_v23, %v403_v22  ;;  %v1148_v27 = vpack.c.bf16 %v410_v25, %v408_v24  ;;  %v615_v22 = vld [vmem:[#allocation7 + $0x110] sm:$0xff]  ;;  %v624_v24 = vld [vmem:[#allocation7 + $0x158] sm:$0xff] }
  0xc8   : > { %v619_v23 = vld [vmem:[#allocation7 + $0x130] sm:$0xff]  ;;  %v628_v25 = vld [vmem:[#allocation7 + $0x178] sm:$0xff] }
  0xca   : > { %1119 = vmatpush1.bf16.msra.mxu0 %v1118_v37  ;;  %v701_v37 = vld [vmem:[#allocation7 + $0x3c0] sm:$0xff] }
  0xcb   : > { %1121 = vmatprep.subr.bf16.mxu0 %v1120_v38  ;;  %v705_v38 = vld [vmem:[#allocation7 + $0x3e0] sm:$0xff] }
  0xcc   : > { %v1214_v39 = vpack.c.bf16 %v705_v38, %v701_v37  ;;  %v644_v37 = vld [vmem:[#allocation7 + $0x1f8] sm:$0xff]  ;;  %v1242_v38 = vpack.c.bf16 %v635_v35, %v631_v34  ;;  %v707_v34 = vld [vmem:[#allocation7 + $0x3f0] sm:$0xff] }
  0xce   : > { %1123 = vmatpush1.bf16.msra.mxu0 %v1122_v49  ;;  %1215 = vmatpush1.bf16.msra.mxu1 %v1214_v39  ;;  %v420_v49 = vrot.slane %v411_v46, %v419_v47  ;;  %v1244_v39 = vpack.c.bf16 %v644_v37, %v640_v36  ;;  %v1246_v46 = vpack.c.bf16 %v643_v41, %v639_v40  ;;  %v709_v36 = vld [vmem:[%s1858_s4] sm:$0xf]  ;;  %v725_v41 = vsub.s32 3, %v1761_v44 }
  0xcf   : > { %1125 = vmatprep.subr.bf16.mxu0 %v1124_v50  ;;  %1217 = vmatprep.subr.bf16.mxu1 %v1216_v42  ;;  %v648_v42 = vld [vmem:[#allocation7 + $0x218] sm:$0xff]  ;;  %v714_v37 = vrot.slane %v709_v36, %v415_v45  ;;  %v721_v45 = vsub.s32 2, %v1761_v44 }
  0xd2   : > { %1127 = vmatpush1.bf16.msra.mxu0 %v1126_v59 }
  0xd3   : > { %1129 = vmatprep.subr.bf16.mxu0 %v1128_v60  ;;  %v1218_v60 = vpack.c.bf16 %v587_v54, %v583_v53  ;;  %v660_v53 = vld [vmem:[#allocation7 + $0x278] sm:$0xff] }
  0xd6   : > { %1131 = vmatpush1.bf16.msra.mxu0 %v1130_v2  ;;  %v595_v2 = vld [vmem:[#allocation7 + $0x70] sm:$0xff] }
  0xd7   : > { %1133 = vmatprep.subr.bf16.mxu0 %v1132_v3  ;;  %v1222_v7 = vpack.c.bf16 %v595_v2, %v591_v1  ;;  %v667_v1 = vld [vmem:[#allocation7 + $0x2b0] sm:$0xff]  ;;  %v672_v2 = vld [vmem:[#allocation7 + $0x2d8] sm:$0xff] }
  0xda   : > { %1135 = vmatpush1.bf16.msra.mxu0 %v1134_v8 }
  0xdb   : > { %1137 = vmatprep.subr.bf16.mxu0 %v1136_v9  ;;  %v1224_v9 = vpack.c.bf16 %v604_v5, %v600_v4  ;;  %v676_v4 = vld [vmem:[#allocation7 + $0x2f8] sm:$0xff] }
  0xde   : > { %1139 = vmatpush1.bf16.msra.mxu0 %v1138_v14  ;;  %v1226_v14 = vpack.c.bf16 %v603_v11, %v599_v10  ;;  %v675_v10 = vld [vmem:[#allocation7 + $0x2f0] sm:$0xff]  ;;  %v680_v11 = vld [vmem:[#allocation7 + $0x318] sm:$0xff] }
  0xdf   : > { %1141 = vmatprep.subr.bf16.mxu0 %v1140_v15  ;;  %v1228_v15 = vpack.c.bf16 %v612_v13, %v608_v12  ;;  %v684_v12 = vld [vmem:[#allocation7 + $0x338] sm:$0xff] }
  0xe2   : > { %1143 = vmatpush1.bf16.msra.mxu0 %v1142_v20  ;;  %v1230_v20 = vpack.c.bf16 %v611_v17, %v607_v16  ;;  %v683_v16 = vld [vmem:[#allocation7 + $0x330] sm:$0xff]  ;;  %v688_v17 = vld [vmem:[#allocation7 + $0x358] sm:$0xff] }
  0xe3   : > { %1145 = vmatprep.subr.bf16.mxu0 %v1144_v21  ;;  %v1232_v21 = vpack.c.bf16 %v620_v19, %v616_v18  ;;  %v692_v18 = vld [vmem:[#allocation7 + $0x378] sm:$0xff] }
  0xe6   : > { %1147 = vmatpush1.bf16.msra.mxu0 %v1146_v26  ;;  %v1234_v26 = vpack.c.bf16 %v619_v23, %v615_v22  ;;  %v691_v22 = vld [vmem:[#allocation7 + $0x370] sm:$0xff]  ;;  %v696_v23 = vld [vmem:[#allocation7 + $0x398] sm:$0xff] }
  0xe7   : > { %1149 = vmatprep.subr.bf16.mxu0 %v1148_v27  ;;  %v1236_v27 = vpack.c.bf16 %v628_v25, %v624_v24  ;;  %v700_v24 = vld [vmem:[#allocation7 + $0x3b8] sm:$0xff] }
  0xea   : > { %1151 = vmatpush1.bf16.msra.mxu0 %v1150_v30  ;;  %v632_v30 = vld [vmem:[#allocation7 + $0x198] sm:$0xff] }
  0xed   : > { %565 = vmatmul.mubr.f32.vlgmr.msra.gmra.mrb[0].mxu0 %v277_v31  ;;  %v636_v31 = vld [vmem:[#allocation7 + $0x1b8] sm:$0xff] }
  0xee   : > { %570 = vmatprep.mubr.f32.mxu0 %v282_v32  ;;  %v1238_v32 = vpack.c.bf16 %v627_v29, %v623_v28  ;;  %v699_v28 = vld [vmem:[#allocation7 + $0x3b0] sm:$0xff]  ;;  %v704_v29 = vld [vmem:[#allocation7 + $0x3d8] sm:$0xff] }
  0xf1   : > { %571 = vmatmul.mubr.f32.gmra.mrb[2].mxu0 %v281_v33  ;;  %v1240_v33 = vpack.c.bf16 %v636_v31, %v632_v30  ;;  %v708_v30 = vld [vmem:[#allocation7 + $0x3f8] sm:$0xff] }
 0x1c0   : > { %v566_v50 = vpop.f32.mrb[0].mxu0 }
 0x1c1   : > { %v1772_v51 = vadd.f32 %v566_v50, %v416_v48  ;;  %v568_v52 = vpop.f32.mrb[1].mxu0  ;;  %v651_v50 = vld [vmem:[#allocation7 + $0x230] sm:$0xff] }
 0x1c2   : > { %v1281_v55 = vadd.f32 %v568_v52, %v420_v49  ;;  %v656_v52 = vld [vmem:[#allocation7 + $0x258] sm:$0xff] }
 0x1c3   : > { %v577_v61 = vmax.f32 %v1772_v51, 0.0 }
 0x1c4   : > { %v578_v58 = vmax.f32 %v1281_v55, 0.0  ;;  %v572_v59 = vpop.f32.mrb[2].mxu0  ;;  %v1252_v55 = vpack.c.bf16 %v660_v53, %v656_v52 }
 0x1c5   : > { %v1775_v62 = vadd.f32 %v572_v59, %v416_v48  ;;  %v574_v63 = vpop.f32.mrb[3].mxu0  ;;  %v1248_v48 = vpack.c.bf16 %v652_v43, %v648_v42  ;;  %v668_v59 = vld [vmem:[#allocation7 + $0x2b8] sm:$0xff]  ;;  %v726_v42 = vrot.slane %v709_v36, %v725_v41 }
 0x1c6   : > { %v1777_v3 = vadd.f32 %v574_v63, %v420_v49  ;;  %795 = vmatprep.mubr.f32.mxu1 %v578_v58  ;;  %v647_v49 = vld [vmem:[#allocation7 + $0x210] sm:$0xff] }
 0x1c7   : > { %796 = vmatmul.mubr.f32.vlgmr.msra.gmra.mrb[0].mxu1 %v577_v61  ;;  %v579_v8 = vmax.f32 %v1775_v62, 0.0  ;;  %v1250_v54 = vpack.c.bf16 %v651_v50, %v647_v49 }
 0x1c8   : > { %v580_v6 = vmax.f32 %v1777_v3, 0.0  ;;  %1219 = vmatpush1.bf16.msra.mxu1 %v1218_v60  ;;  %v1254_v60 = vpack.c.bf16 %v659_v57, %v655_v56 }
 0x1c9   : > { %1221 = vmatprep.subr.bf16.mxu1 %v1220_v0  ;;  %v663_v0 = vld [vmem:[#allocation7 + $0x290] sm:$0xff] }
 0x1ca   : > { %801 = vmatprep.mubr.f32.mxu1 %v580_v6  ;;  %v1258_v5 = vpack.c.bf16 %v667_v1, %v663_v0 }
 0x1cb   : > { %802 = vmatmul.mubr.f32.gmra.mrb[2].mxu1 %v579_v8 }
 0x1cc   : > { %1223 = vmatpush1.bf16.msra.mxu1 %v1222_v7  ;;  %872 = vmatprep.mubr.f32.mxu1 %v578_v58  ;;  %v664_v58 = vld [vmem:[#allocation7 + $0x298] sm:$0xff]  ;;  %v1260_v7 = vpack.c.bf16 %v676_v4, %v672_v2 }
 0x1cd   : > { %1225 = vmatprep.subr.bf16.mxu1 %v1224_v9  ;;  %v1256_v63 = vpack.c.bf16 %v668_v59, %v664_v58  ;;  %v671_v9 = vld [vmem:[#allocation7 + $0x2d0] sm:$0xff] }
 0x1ce   : > { %v1262_v13 = vpack.c.bf16 %v675_v10, %v671_v9 }
 0x1d0   : > { %1227 = vmatpush1.bf16.msra.mxu1 %v1226_v14  ;;  %v1264_v14 = vpack.c.bf16 %v684_v12, %v680_v11 }
 0x1d1   : > { %1229 = vmatprep.subr.bf16.mxu1 %v1228_v15  ;;  %v679_v15 = vld [vmem:[#allocation7 + $0x310] sm:$0xff] }
 0x1d2   : > { %v1266_v19 = vpack.c.bf16 %v683_v16, %v679_v15 }
 0x1d4   : > { %1231 = vmatpush1.bf16.msra.mxu1 %v1230_v20  ;;  %v1268_v20 = vpack.c.bf16 %v692_v18, %v688_v17 }
 0x1d5   : > { %1233 = vmatprep.subr.bf16.mxu1 %v1232_v21  ;;  %v687_v21 = vld [vmem:[#allocation7 + $0x350] sm:$0xff] }
 0x1d6   : > { %v1270_v25 = vpack.c.bf16 %v691_v22, %v687_v21 }
 0x1d8   : > { %1235 = vmatpush1.bf16.msra.mxu1 %v1234_v26  ;;  %v1272_v26 = vpack.c.bf16 %v700_v24, %v696_v23 }
 0x1d9   : > { %1237 = vmatprep.subr.bf16.mxu1 %v1236_v27  ;;  %v695_v27 = vld [vmem:[#allocation7 + $0x390] sm:$0xff] }
 0x1da   : > { %v1274_v31 = vpack.c.bf16 %v699_v28, %v695_v27 }
 0x1dc   : > { %1239 = vmatpush1.bf16.msra.mxu1 %v1238_v32  ;;  %v1276_v32 = vpack.c.bf16 %v708_v30, %v704_v29 }
 0x1dd   : > { %1241 = vmatprep.subr.bf16.mxu1 %v1240_v33  ;;  %v703_v33 = vld [vmem:[#allocation7 + $0x3d0] sm:$0xff] }
 0x1de   : > { %v1278_v35 = vpack.c.bf16 %v707_v34, %v703_v33 }
 0x1e0   : > { %1243 = vmatpush1.bf16.msra.mxu1 %v1242_v38  ;;  %v718_v38 = vrot.slane %v709_v36, %v419_v47  ;;  %v722_v47 = vrot.slane %v709_v36, %v721_v45 }
 0x1e1   : > { %1245 = vmatprep.subr.bf16.mxu1 %v1244_v39 }
 0x1e4   : > { %1247 = vmatpush1.bf16.msra.mxu1 %v1246_v46 }
 0x1e5   : > { %1249 = vmatprep.subr.bf16.mxu1 %v1248_v48 }
 0x1e8   : > { %1251 = vmatpush1.bf16.msra.mxu1 %v1250_v54 }
 0x1e9   : > { %1253 = vmatprep.subr.bf16.mxu1 %v1252_v55 }
 0x1ec   : > { %1255 = vmatpush1.bf16.msra.mxu1 %v1254_v60 }
 0x1ed   : > { %1257 = vmatprep.subr.bf16.mxu1 %v1256_v63 }
 0x1f0   : > { %1259 = vmatpush1.bf16.msra.mxu1 %v1258_v5 }
 0x1f1   : > { %1261 = vmatprep.subr.bf16.mxu1 %v1260_v7 }
 0x1f4   : > { %1263 = vmatpush1.bf16.msra.mxu1 %v1262_v13 }
 0x1f5   : > { %1265 = vmatprep.subr.bf16.mxu1 %v1264_v14 }
 0x1f8   : > { %1267 = vmatpush1.bf16.msra.mxu1 %v1266_v19 }
 0x1f9   : > { %1269 = vmatprep.subr.bf16.mxu1 %v1268_v20 }
 0x1fc   : > { %1271 = vmatpush1.bf16.msra.mxu1 %v1270_v25 }
 0x1fd   : > { %1273 = vmatprep.subr.bf16.mxu1 %v1272_v26 }
 0x200   : > { %1275 = vmatpush1.bf16.msra.mxu1 %v1274_v31 }
 0x201   : > { %1277 = vmatprep.subr.bf16.mxu1 %v1276_v32 }
 0x204   : > { %1279 = vmatpush1.bf16.msra.mxu1 %v1278_v35 }
 0x207   : > { %873 = vmatmul.mubr.f32.vlgmr.msra.gmra.mrb[4].mxu1 %v577_v61 }
 0x208   : > { %878 = vmatprep.mubr.f32.mxu1 %v580_v6 }
 0x20b   : > { %879 = vmatmul.mubr.f32.gmra.mrb[6].mxu1 %v579_v8 }
 0x29a   : > { %v797_v39 = vpop.f32.mrb[0].mxu1 }
 0x29b   : > { %v798_v40 = vadd.f32 %v797_v39, %v714_v37  ;;  %v799_v51 = vpop.f32.mrb[1].mxu1 }
 0x29c   : > { %v800_v61 = vadd.f32 %v799_v51, %v718_v38 }
 0x29d   : > { %885 = vst [vmem:[%s272_s10] sm:$0xff] %v798_v40 }
 0x29e   : > { %886 = vst [vmem:[%s272_s10 + $0x8] sm:$0xff] %v800_v61  ;;  %v803_v62 = vpop.f32.mrb[2].mxu1 }
 0x29f   : > { %v804_v3 = vadd.f32 %v803_v62, %v714_v37  ;;  %v805_v6 = vpop.f32.mrb[3].mxu1 }
 0x2a0   : > { %v806_v8 = vadd.f32 %v805_v6, %v718_v38 }
 0x2a1   : > { %889 = vst [vmem:[%s272_s10 + $0x20] sm:$0xff] %v804_v3 }
 0x2a2   : > { %890 = vst [vmem:[%s272_s10 + $0x28] sm:$0xff] %v806_v8 }
 0x2da   : > { %v874_v43 = vpop.f32.mrb[4].mxu1 }
 0x2db   : > { %v875_v46 = vadd.f32 %v874_v43, %v722_v47  ;;  %v876_v48 = vpop.f32.mrb[5].mxu1 }
 0x2dc   : > { %v877_v49 = vadd.f32 %v876_v48, %v726_v42 }
 0x2dd   : > { %887 = vst [vmem:[%s272_s10 + $0x10] sm:$0xff] %v875_v46 }
 0x2de   : > { %888 = vst [vmem:[%s272_s10 + $0x18] sm:$0xff] %v877_v49  ;;  %v880_v50 = vpop.f32.mrb[6].mxu1 }
 0x2df   : > { %v881_v52 = vadd.f32 %v880_v50, %v722_v47  ;;  %v882_v44 = vpop.f32.mrb[7].mxu1 }
 0x2e0   : > { %v883_v53 = vadd.f32 %v882_v44, %v726_v42 }
 0x2e1   : > { %891 = vst [vmem:[%s272_s10 + $0x30] sm:$0xff] %v881_v52 }
 0x2e2   : > { %892 = vst [vmem:[%s272_s10 + $0x38] sm:$0xff] %v883_v53 }
 0x2e3   : > { %1460 = shalt.err (!%p1457_p2)
}
 0x2e4   : > { %s1461_s14 = scalar_lea.hbm %s1810_s11, 1024  ;;  %s1465_s12 = scalar_lea.hbm %s1859_s5, 2048 }
 0x2e5   : > { %p1462_p13 = scmp.ne.s32.totalorder %s1810_s11, %s1461_s14  ;;  %p1466_p4 = scmp.lt.u32.totalorder %s1810_s11, %s1859_s5 }
 0x2e6   : > { %p1467_p7 = scmp.lt.u32.totalorder %s1465_s12, %s1461_s14  ;;  %p1469_p11 = scmp.lt.u32.totalorder %s1461_s14, %s1810_s11 }
 0x2e7   : > { %p1463_p6 = pnand %p1462_p13, %p1873_p0 }
 0x2e8   : > { %p1468_p8 = por %p1467_p7, %p1466_p4 }
 0x2e9   : > { %p1464_p10 = pneg %p1463_p6 }
 0x2ea   : > { %p1470_p1 = por %p1469_p11, %p1468_p8 }
 0x2ec   : > { %p1471_p3 = pnand %p1470_p1, %p1464_p10 }
 0x2ee   : > { %1474 = shalt.err (!%p1471_p3)
}
 0x2ef   : > { %s1527_s15 = smov 512   ;;  %s1528_s9 = smov 32  }
 0x2f0   : > { %1298 = dma.vmem_to_hbm [thread:$0]  (%p1873_p0), %s1805_s28, 1024, %s1810_s11, %s894_s23, %s1527_s15, %s1527_s15, %s1528_s9  }
 0x2f1 PF: > { %s923_s30 = sand.u32 1, %s1505_s18   ;;  %p1874_p5 = scmp.ne.s32.totalorder %s1864_s25, 0 }
 0x2f2   : > { %p1875_p9 = scmp.ge.s32.totalorder %s1517_s21, 2  ;;  %s924_s22 = scalar_lea.sflag [#allocation4], %s923_s30 }
 0x2f4   : > { %p1312_p12 = pnand %p1875_p9, %p1874_p5 }
 0x2f6   : > { %1500 = dma.done.wait (!%p1312_p12), %s924_s22, 1024  }
 0x2f7   : > { %1502 = vsyncadd (!%p1312_p12), %s924_s22, 4294966272  ;;  %p19_p2 = scmp.ge.s32.totalorder %s1672_s16, 4   ;;  %s1876_s18 = smov %s1509_s19 }
 0x2f8   : > { %s1877_s19 = smov %s1513_s20  ;;  %s1878_s20 = smov %s1681_s27 }
 0x2f9   : > { %s1879_s21 = smov %s1672_s16  ;;  %21 = sbr.rel (!%p19_p2) target bundleno = 6 (0x6), region = 93 }
 0x300   :  { %929 = vsyncpa [#allocation3], 1 }
 0x301   :  { %931 = vsyncpa [#allocation3 + $0x1], 1 }
 0x302   :  { %932 = vsyncpa [#allocation6], 1 }
 0x303   :  { %933 = vsyncpa [#allocation4], 1 }
 0x304   :  { %935 = vsyncpa [#allocation4 + $0x1], 1 }

</bundles_post_ra>
